<compile_context>
chip_gen: v7x
topology: tpu7x:2x2x1
jax: 0.10.0
libtpu: 0.0.40
codegen_flags: <defaults>
</compile_context>

<pallas_src>
import jax
import jax.numpy as jnp
from jax.experimental import pallas as pl
from jax.experimental.pallas import tpu as pltpu


def _autoencoder_kernel(x_ref, wet_ref, be_ref, wdt_ref, bd_ref, o_ref):
    # x_ref : (C, TN)  io dtype       wet_ref: (C_hid, C)
    # be_ref: (C_hid, 1) f32          wdt_ref: (C, C_hid)
    # bd_ref: (C, 1)     f32          o_ref  : (C, TN)  io dtype
    # Contraction dims (C, C_hid) are tiny; MXU output dim is the lane-dense
    # pixel tile. Bias + ReLU run in f32 on the VPU (v5e-safe).
    h = jnp.dot(wet_ref[...], x_ref[...], preferred_element_type=jnp.float32)
    h = jnp.maximum(h + be_ref[...], 0.0)
    y = jnp.dot(wdt_ref[...], h, preferred_element_type=jnp.float32)
    o_ref[...] = (y + bd_ref[...]).astype(o_ref.dtype)


def base_attention_forward(x_nchw, w_enc, b_enc, w_dec, b_dec, *,
                           io_dtype=None, target_step_bytes=2 << 20):
    """x_nchw: (B, C, H, W) -> reconstructed (B, C, H, W) in io_dtype
    (default: x's dtype, preserving the module's f32 semantics)."""
    B, C, H, W = x_nchw.shape
    C_hid = w_enc.shape[1]
    assert w_enc.shape == (C, C_hid) and w_dec.shape == (C_hid, C)
    HW = H * W

    io_dtype = jnp.dtype(io_dtype) if io_dtype is not None else jnp.dtype(x_nchw.dtype)
    io_itemsize = io_dtype.itemsize

    # ---- Pixel-tile derivation -------------------------------------------
    # Target ~target_step_bytes of in+out HBM traffic per grid step, bounded by
    # a VMEM budget that accounts for sublane padding (C < 8 rows still occupy
    # 8 sublanes in VMEM), double-buffered I/O tiles and f32 intermediates.
    hw128 = pl.cdiv(HW, 128) * 128
    c_sub = max(C, 8)
    ch_sub = max(C_hid, 8)
    per_tn_vmem = (2 * c_sub * io_itemsize      # input tile, double-buffered
                   + 2 * c_sub * io_itemsize    # output tile, double-buffered
                   + ch_sub * 4                 # hidden intermediate h (f32)
                   + c_sub * 4)                 # decoder intermediate y (f32)
    vmem_budget = 40 << 20                      # <= v7x 64 MiB/TC with headroom
    tn_vmem_max = max(128, (vmem_budget // per_tn_vmem) // 128 * 128)
    tn_target = max(128, (target_step_bytes // (2 * C * io_itemsize)) // 128 * 128)
    tn = min(tn_target, tn_vmem_max, hw128)
    n_tiles = pl.cdiv(HW, tn)

    # Keep at least two grid steps so v7x's two TensorCores both get work.
    if B * n_tiles < 2 and hw128 >= 256:
        tn = max(128, pl.cdiv(hw128 // 2, 128) * 128)
        n_tiles = pl.cdiv(HW, tn)

    # Native layout view: channels on sublanes, pixels lane-dense. No pad/slice.
    x3 = x_nchw.reshape(B, C, HW).astype(io_dtype)

    # Tiny resident operands, pre-oriented for the (C, pixels) tile math.
    wet = jnp.transpose(w_enc)                    # (C_hid, C)
    wdt = jnp.transpose(w_dec)                    # (C, C_hid)
    be2 = b_enc.reshape(C_hid, 1).astype(jnp.float32)
    bd2 = b_dec.reshape(C, 1).astype(jnp.float32)

    w_itemsize = jnp.dtype(w_enc.dtype).itemsize
    cost = pl.CostEstimate(
        flops=2 * B * HW * (C * C_hid + C_hid * C),
        transcendentals=0,
        bytes_accessed=2 * B * HW * C * io_itemsize
        + (2 * C * C_hid + C_hid + C) * w_itemsize,
    )

    footprint = per_tn_vmem * tn + (2 * C * C_hid + C_hid + C) * 4 * 2
    vmem_limit = int(min(max(2 * footprint, 16 << 20), 48 << 20))

    out3 = pl.pallas_call(
        _autoencoder_kernel,
        out_shape=jax.ShapeDtypeStruct((B, C, HW), io_dtype),
        grid_spec=pltpu.PrefetchScalarGridSpec(
            num_scalar_prefetch=0,
            grid=(B, n_tiles),
            in_specs=[
                pl.BlockSpec((None, C, tn), lambda b, j: (b, 0, j)),  # x tile
                pl.BlockSpec((C_hid, C), lambda b, j: (0, 0)),        # W_enc^T (resident)
                pl.BlockSpec((C_hid, 1), lambda b, j: (0, 0)),        # b_enc
                pl.BlockSpec((C, C_hid), lambda b, j: (0, 0)),        # W_dec^T (resident)
                pl.BlockSpec((C, 1), lambda b, j: (0, 0)),            # b_dec
            ],
            out_specs=pl.BlockSpec((None, C, tn), lambda b, j: (b, 0, j)),
        ),
        compiler_params=pltpu.CompilerParams(
            dimension_semantics=("parallel", "parallel"),
            vmem_limit_bytes=vmem_limit),
        cost_estimate=cost,
    )(x3, wet, be2, wdt, bd2)

    return out3.reshape(B, C, H, W)


def _reference(x_nchw, w_enc, b_enc, w_dec, b_dec):
    x = jnp.transpose(x_nchw, (0, 2, 3, 1))
    h = jnp.maximum(jnp.einsum("bhwc,cd->bhwd", x, w_enc) + b_enc, 0.0)
    y = jnp.einsum("bhwd,dc->bhwc", h, w_dec) + b_dec
    return jnp.transpose(y, (0, 3, 1, 2))


if __name__ == "__main__":
    B, C, H, W = 2, 4, 16, 16
    C_hid = 8

    key = jax.random.PRNGKey(0)
    kx, k1, k2, k3, k4 = jax.random.split(key, 5)
    x = jax.random.normal(kx, (B, C, H, W), dtype=jnp.float32)
    w_enc = jax.random.normal(k1, (C, C_hid), dtype=jnp.float32) * 0.1
    b_enc = jax.random.normal(k2, (C_hid,), dtype=jnp.float32) * 0.1
    w_dec = jax.random.normal(k3, (C_hid, C), dtype=jnp.float32) * 0.1
    b_dec = jax.random.normal(k4, (C,), dtype=jnp.float32) * 0.1

    ref = _reference(x, w_enc, b_enc, w_dec, b_dec)

    # Default path: f32 I/O, exact module semantics.
    out = base_attention_forward(x, w_enc, b_enc, w_dec, b_dec)
    out = jax.block_until_ready(out)
    assert out.shape == (B, C, H, W) and out.dtype == x.dtype
    assert jnp.allclose(out, ref, atol=1e-5, rtol=1e-5)

    # bf16 I/O path: halves HBM traffic on this bandwidth-bound op
    # (accumulation / bias / ReLU stay f32 in-kernel).
    out_bf16 = base_attention_forward(x, w_enc, b_enc, w_dec, b_dec,
                                      io_dtype=jnp.bfloat16)
    out_bf16 = jax.block_until_ready(out_bf16)
    assert out_bf16.shape == (B, C, H, W) and out_bf16.dtype == jnp.bfloat16
    assert jnp.allclose(out_bf16.astype(jnp.float32), ref, atol=3e-2, rtol=3e-2)

    print("KERNEL_OK")
</pallas_src>

<mosaic_0001>
module attributes {stable_mosaic.version = 11 : i64} {
  func.func @_autoencoder_kernel(%arg0: i32, %arg1: i32, %arg2: memref<1x4x256xf32, #tpu.memory_space<vmem>>, %arg3: memref<8x4xf32, #tpu.memory_space<vmem>>, %arg4: memref<8x1xf32, #tpu.memory_space<vmem>>, %arg5: memref<4x8xf32, #tpu.memory_space<vmem>>, %arg6: memref<4x1xf32, #tpu.memory_space<vmem>>, %arg7: memref<1x4x256xf32, #tpu.memory_space<vmem>>) attributes {dimension_semantics = [#tpu.dimension_semantics<parallel>, #tpu.dimension_semantics<parallel>], iteration_bounds = array<i64: 2, 1>, scalar_prefetch = 0 : i64, scratch_operands = 0 : i64, tpu.core_type = #tpu.core_type<tc>, window_params = [{transform_indices = @transform_0, window_bounds = array<i64: 1, 4, 256>}, {pipeline_mode = #tpu.pipeline_mode<synchronous>, transform_indices = @transform_1, window_bounds = array<i64: 8, 4>}, {pipeline_mode = #tpu.pipeline_mode<synchronous>, transform_indices = @transform_2, window_bounds = array<i64: 8, 1>}, {pipeline_mode = #tpu.pipeline_mode<synchronous>, transform_indices = @transform_3, window_bounds = array<i64: 4, 8>}, {pipeline_mode = #tpu.pipeline_mode<synchronous>, transform_indices = @transform_4, window_bounds = array<i64: 4, 1>}, {transform_indices = @transform_5, window_bounds = array<i64: 1, 4, 256>}]} {
    %c0 = arith.constant 0 : index
    %c0_0 = arith.constant 0 : index
    %0 = vector.load %arg3[%c0, %c0_0] : memref<8x4xf32, #tpu.memory_space<vmem>>, vector<8x4xf32>
    %c0_1 = arith.constant 0 : index
    %c0_2 = arith.constant 0 : index
    %c0_3 = arith.constant 0 : index
    %1 = vector.load %arg2[%c0_1, %c0_2, %c0_3] : memref<1x4x256xf32, #tpu.memory_space<vmem>>, vector<1x4x256xf32>
    %2 = vector.shape_cast %1 : vector<1x4x256xf32> to vector<4x256xf32>
    %cst = arith.constant dense<0.000000e+00> : vector<8x256xf32>
    %3 = tpu.matmul %0, %2, %cst {dimension_numbers = #tpu.dot_dimension_numbers<[1], [0], [0], [1], [0, 0, 1, 1], [], []>} : vector<8x4xf32>, vector<4x256xf32>, vector<8x256xf32> -> vector<8x256xf32>
    %c0_4 = arith.constant 0 : index
    %c0_5 = arith.constant 0 : index
    %4 = vector.load %arg4[%c0_4, %c0_5] : memref<8x1xf32, #tpu.memory_space<vmem>>, vector<8x1xf32>
    %5 = vector.broadcast %4 : vector<8x1xf32> to vector<8x256xf32>
    %6 = arith.addf %3, %5 : vector<8x256xf32>
    %cst_6 = arith.constant 0.000000e+00 : f32
    %7 = vector.broadcast %cst_6 : f32 to vector<8x256xf32>
    %8 = arith.maximumf %6, %7 : vector<8x256xf32>
    %c0_7 = arith.constant 0 : index
    %c0_8 = arith.constant 0 : index
    %9 = vector.load %arg5[%c0_7, %c0_8] : memref<4x8xf32, #tpu.memory_space<vmem>>, vector<4x8xf32>
    %cst_9 = arith.constant dense<0.000000e+00> : vector<4x256xf32>
    %10 = tpu.matmul %9, %8, %cst_9 {dimension_numbers = #tpu.dot_dimension_numbers<[1], [0], [0], [1], [0, 0, 1, 1], [], []>} : vector<4x8xf32>, vector<8x256xf32>, vector<4x256xf32> -> vector<4x256xf32>
    %c0_10 = arith.constant 0 : index
    %c0_11 = arith.constant 0 : index
    %11 = vector.load %arg6[%c0_10, %c0_11] : memref<4x1xf32, #tpu.memory_space<vmem>>, vector<4x1xf32>
    %12 = vector.broadcast %11 : vector<4x1xf32> to vector<4x256xf32>
    %13 = arith.addf %10, %12 : vector<4x256xf32>
    %c0_12 = arith.constant 0 : index
    %c0_13 = arith.constant 0 : index
    %c0_14 = arith.constant 0 : index
    %14 = vector.load %arg7[%c0_12, %c0_13, %c0_14] : memref<1x4x256xf32, #tpu.memory_space<vmem>>, vector<1x4x256xf32>
    %15 = vector.shape_cast %14 : vector<1x4x256xf32> to vector<4x256xf32>
    %16 = vector.shape_cast %13 : vector<4x256xf32> to vector<1x4x256xf32>
    tpu.vector_store %arg7[%c0_12, %c0_13, %c0_14], %16 {strides = array<i32>} : memref<1x4x256xf32, #tpu.memory_space<vmem>>, vector<1x4x256xf32>,
    return
  }
  func.func @transform_0(%arg0: i32, %arg1: i32) -> (i32, i32, i32) {
    %c0_i32 = arith.constant 0 : i32
    %c0_i32_0 = arith.constant 0 : i32
    return %arg0, %c0_i32, %arg1 : i32, i32, i32
  }
  func.func @transform_1(%arg0: i32, %arg1: i32) -> (i32, i32) {
    %c0_i32 = arith.constant 0 : i32
    %c0_i32_0 = arith.constant 0 : i32
    %c0_i32_1 = arith.constant 0 : i32
    return %c0_i32, %c0_i32_0 : i32, i32
  }
  func.func @transform_2(%arg0: i32, %arg1: i32) -> (i32, i32) {
    %c0_i32 = arith.constant 0 : i32
    %c0_i32_0 = arith.constant 0 : i32
    %c0_i32_1 = arith.constant 0 : i32
    return %c0_i32, %c0_i32_0 : i32, i32
  }
  func.func @transform_3(%arg0: i32, %arg1: i32) -> (i32, i32) {
    %c0_i32 = arith.constant 0 : i32
    %c0_i32_0 = arith.constant 0 : i32
    %c0_i32_1 = arith.constant 0 : i32
    return %c0_i32, %c0_i32_0 : i32, i32
  }
  func.func @transform_4(%arg0: i32, %arg1: i32) -> (i32, i32) {
    %c0_i32 = arith.constant 0 : i32
    %c0_i32_0 = arith.constant 0 : i32
    %c0_i32_1 = arith.constant 0 : i32
    return %c0_i32, %c0_i32_0 : i32, i32
  }
  func.func @transform_5(%arg0: i32, %arg1: i32) -> (i32, i32, i32) {
    %c0_i32 = arith.constant 0 : i32
    %c0_i32_0 = arith.constant 0 : i32
    return %arg0, %c0_i32, %arg1 : i32, i32, i32
  }
}

</mosaic_0001>

<bundles_post_ra>
// kernel: tpu_custom_call.1
= control target key start
LH: loop header
LB: loop body
LE: loop exit
PB: predicated region body
PF: predicated region fallthrough
CT: control target
= control target key end

     0   :  { %10 = vsyncpa [#allocation3], 0  ;;  %s841_s0 = inlined_call_operand.vmem [shape: f32[2,4,256], index: 0, kind: input, shape index: {}]   ;;  %s842_s1 = inlined_call_operand.vmem [shape: f32[8,4], index: 1, kind: input, shape index: {}]   ;;  %s843_s2 = inlined_call_operand.vmem [shape: f32[8,1], index: 2, kind: input, shape index: {}]   ;;  %s844_s3 = inlined_call_operand.vmem [shape: f32[4,8], index: 3, kind: input, shape index: {}]   ;;  %s845_s4 = inlined_call_operand.vmem [shape: f32[4,1], index: 4, kind: input, shape index: {}]   ;;  %s846_s5 = inlined_call_operand.hbm [shape: f32[2,4,256], index: 5, kind: output, shape index: {}]  }
   0x1   :  { %12 = vsyncpa [#allocation3 + $0x1], 0  ;;  %s717_s18 = smov 0   ;;  %s719_s19 = smov 0  }
   0x2   :  { %s721_s20 = smov 0   ;;  %s723_s21 = smov 0  }
   0x3   :  { %s725_s22 = smov 0   ;;  %s727_s23 = smov 0  }
   0x4 LB: > { %s526_s24 = sadd.s32 4294967295, %s682_s23   ;;  %s527_s25 = sadd.s32 4294967294, %s682_s23   ;;  %s682_s23 = sphi %s727_s23, %s18_s23   ;;  %s678_s22 = sphi %s725_s22, %s853_s22   ;;  %s674_s21 = sphi %s723_s21, %s852_s21   ;;  %s670_s20 = sphi %s721_s20, %s851_s20   ;;  %s666_s19 = sphi %s719_s19, %s850_s19   ;;  %s662_s18 = sphi %s717_s18, %s849_s18  }
   0x5   : > { %s30_s26 = sadd.s32 1, %s678_s22  ;;  %s151_s27 = sadd.s32 1, %s670_s20 }
   0x6   : > { %p32_p0 = scmp.ge.s32.totalorder %s30_s26, 2  ;;  %p161_p1 = scmp.ne.s32.totalorder %s670_s20, %s666_s19 }
   0x7   : > { %p162_p2 = scmp.eq.s32.totalorder %s526_s24, 1  ;;  %p167_p3 = scmp.ne.s32.totalorder %s666_s19, %s662_s18 }
   0x8   : > { %s855_s26 = smov (%p32_p0, %s30_s26), 0  ;;  %p168_p5 = scmp.eq.s32.totalorder %s527_s25, 1 }
   0x9   : > { %p757_p4 = por %p162_p2, %p161_p1  ;;  %s146_s29 = ssub.s32 %s678_s22, %s855_s26 }
   0xa   : > { %p530_p6 = scmp.ge.s32.totalorder %s682_s23, 1  ;;  %p149_p7 = scmp.eq.s32.totalorder %s146_s29, 0 }
   0xb   : > { %p764_p8 = por %p168_p5, %p167_p3  ;;  %p211_p9 = scmp.lt.s32.totalorder %s682_s23, 3 }
   0xc   : > { %s770_s6 = scalar_select %p149_p7, %s670_s20, %s151_s27  }
   0xd   : > { %p212_p10 = pnand %p530_p6, %p211_p9 }
   0xe   : > { %p244_p11 = scmp.lt.s32.totalorder (!%p212_p10), %s674_s21, 1  ;;  %v684_v0 = vmov (!%p212_p10), 0.0   ;;  %v685_v1 = vmov (!%p212_p10), 0   ;;  %v256_v2 = vld [vmem:[%s843_s2] sm:$0xff] (!%p212_p10)  ;;  %vm268_vm0 = vcmask (!%p212_p10), 1043456   ;;  %vm264_vm1 = vcmask (!%p212_p10), 31744  }
   0xf   : > { %215 = sbr.rel (%p212_p10) target bundleno = 481 (0x1e1), region = 40  ;;  %337 = vmatprep.mubr.f32.mxu0 (!%p212_p10), %v684_v0  ;;  %602 = vset.pattern.permute.xlu0 (!%p212_p10), %v685_v1  ;;  %v347_v3 = vld [vmem:[%s845_s4] sm:$0xf] (!%p212_p10)  ;;  %vm353_vm2 = vcmask (!%p212_p10), 64512   ;;  %s240_s27 = sand.u32 (!%p212_p10), 1, %s666_s19  }
  0x10   : > { %259 = vperm.xlu0 (!%p212_p10), %602, %v256_v2   ;;  %421 = vmatprep.mubr.f32.mxu1 (!%p212_p10), %v684_v0  ;;  %v254_v6 = vld [vmem:[%s842_s1] sm:$0xff] (!%p212_p10)  ;;  %s531_s29 = sshll.u32 (!%p212_p10), %s240_s27, 3  ;;  %s544_s7 = sshll.u32 (!%p212_p10), %s674_s21, 7 }
  0x11   : > { %v346_v14 = vld [vmem:[%s844_s3] sm:$0xf] (!%p212_p10)  ;;  %s242_s8 = scalar_lea.vmem (!%p212_p10), [#allocation2], %s531_s29  ;;  %s434_s13 = scalar_lea.sflag (!%p212_p10), [#allocation3], %s240_s27 }
  0x14   : > { %350 = vperm.xlu0 (!%p212_p10), %602, %v347_v3  }
  0x16   : > { %s245_s9 = scalar_select %p244_p11, %s674_s21, 1 }
  0x17   : > { %s686_s21 = smov [#allocation2]  }
  0x18   : > { %s543_s12 = sshll.u32 %s245_s9, 3  ;;  %s450_s9 = sshll.u32 %s242_s8, 4  ;;  %s796_s9 = int_to_ptr.vmem [resolvable:$true] %s450_s9 }
  0x19   : > { %s251_s15 = scalar_lea.vmem %s841_s0, %s543_s12  ;;  %s794_s12 = scalar_lea.hbm %s846_s5, %s544_s7 }
  0x1a   : > { %v255_v4 = vld [vmem:[%s251_s15] sm:$0xff]  ;;  %s604_s14 = scalar_lea.vmem %s796_s9, 128  ;;  %s608_s15 = sshll.u32 %s686_s21, 4  ;;  %s609_s15 = int_to_ptr.vmem [resolvable:$false] %s608_s15 }
  0x1b   : > { %v263_v5 = vcombine.high %v255_v4, %v255_v4  ;;  %p605_p12 = scmp.ne.s32.totalorder %s796_s9, %s604_s14  ;;  %s610_s16 = scalar_lea.vmem %s609_s15, 256 }
  0x1c   : > { %p611_p1 = scmp.lt.s32.totalorder %s796_s9, %s609_s15  ;;  %p612_p2 = scmp.lt.s32.totalorder %s610_s16, %s604_s14 }
  0x1d   : > { %534 = vmatprep.subr.msk.mxu0 %vm268_vm0, %v263_v5  ;;  %p606_p13 = pnand %p605_p12, %p757_p4 }
  0x1e   : > { %535 = vmatpush1.msk.msra.mxu0 %vm268_vm0, %v255_v4  ;;  %p613_p3 = por %p612_p2, %p611_p1 }
  0x1f   : > { %536 = vmatmul.mubr.msk.f32.vlgmr.msra.gmra.mrb[0].mxu0 %vm264_vm1, %v254_v6  ;;  %p607_p0 = pneg %p606_p13 }
  0x21   : > { %p614_p5 = pnand %p613_p3, %p607_p0 }
  0x8f   : > { %v260_v7 = vpop.permute.xlu0 %259 }
  0x93   : > { %v351_v15 = vpop.permute.xlu0 %350 }
  0xf2   : > { %v339_v8 = vpop.f32.mrb[0].mxu0 }
  0xf3   : > { %v340_v9 = vadd.f32 %v339_v8, %v260_v7  ;;  %v341_v10 = vpop.f32.mrb[1].mxu0 }
  0xf4   : > { %v342_v11 = vadd.f32 %v341_v10, %v260_v7 }
  0xf5   : > { %v344_v13 = vmax.f32 %v340_v9, 0.0 }
  0xf6   : > { %v345_v12 = vmax.f32 %v342_v11, 0.0 }
  0xf8   : > { %357 = vmatprep.subr.mxu1 %v345_v12 }
  0xf9   : > { %358 = vmatpush1.msra.mxu1 %v344_v13 }
  0xfa   : > { %537 = vmatmul.mubr.msk.f32.vlgmr.msra.gmra.mrb[0].mxu1 %vm353_vm2, %v346_v14 }
 0x1cd   : > { %v423_v16 = vpop.f32.mrb[0].mxu1 }
 0x1ce   : > { %v424_v17 = vadd.f32 %v423_v16, %v351_v15  ;;  %v425_v18 = vpop.f32.mrb[1].mxu1 }
 0x1cf   : > { %v426_v19 = vadd.f32 %v425_v18, %v351_v15 }
 0x1d1   : > { %v430_v20 = vcombine.low %v424_v17, %v426_v19 }
 0x1d3   : > { %432 = vst [vmem:[%s242_s8] sm:$0xff] %v430_v20 }
 0x1d4   : > { %617 = shalt.err (!%p614_p5)
}
 0x1d5   : > { %s618_s17 = scalar_lea.hbm %s794_s12, 128  ;;  %s622_s27 = scalar_lea.hbm %s846_s5, 256 }
 0x1d6   : > { %p619_p6 = scmp.ne.s32.totalorder %s794_s12, %s618_s17  ;;  %p623_p10 = scmp.lt.u32.totalorder %s794_s12, %s846_s5 }
 0x1d7   : > { %p624_p11 = scmp.lt.u32.totalorder %s622_s27, %s618_s17  ;;  %p626_p13 = scmp.lt.u32.totalorder %s618_s17, %s794_s12 }
 0x1d8   : > { %p620_p7 = pnand %p619_p6, %p757_p4 }
 0x1d9   : > { %p625_p12 = por %p624_p11, %p623_p10 }
 0x1da   : > { %p621_p9 = pneg %p620_p7 }
 0x1db   : > { %p627_p0 = por %p626_p13, %p625_p12 }
 0x1dd   : > { %p628_p1 = pnand %p627_p0, %p621_p9 }
 0x1df   : > { %631 = shalt.err (!%p628_p1)
}
 0x1e0   : > { %545 = dma.vmem_to_hbm [thread:$0]  (%p757_p4), %s796_s9, 128, %s794_s12, %s434_s13  }
 0x1e1 PF: > { %p551_p2 = scmp.ge.s32.totalorder %s682_s23, 2  ;;  %s462_s8 = sand.u32 1, %s662_s18  }
 0x1e2   : > { %s463_s10 = scalar_lea.sflag [#allocation3], %s462_s8 }
 0x1e3   : > { %p548_p3 = pnand %p551_p2, %p764_p8 }
 0x1e5   : > { %657 = dma.done.wait (!%p548_p3), %s463_s10, 128  }
 0x1e6   : > { %659 = vsyncadd (!%p548_p3), %s463_s10, 4294967168  ;;  %s18_s23 = sadd.s32 1, %s682_s23   ;;  %s849_s18 = smov %s666_s19 }
 0x1e7   : > { %p15_p5 = scmp.ge.s32.totalorder %s18_s23, 4   ;;  %s850_s19 = smov %s670_s20 }
 0x1e8   : > { %s851_s20 = smov %s770_s6  ;;  %s852_s21 = smov %s678_s22 }
 0x1e9   : > { %s853_s22 = smov %s855_s26  ;;  %17 = sbr.rel (!%p15_p5) target bundleno = 4 (0x4), region = 75 }
 0x1f0   :  { %468 = vsyncpa [#allocation3], 1 }
 0x1f1   :  { %470 = vsyncpa [#allocation3 + $0x1], 1 }

</bundles_post_ra>
